<compile_context>
chip_gen: v7x
topology: tpu7x:2x2x1
jax: 0.10.0
libtpu: 0.0.40
codegen_flags: <defaults>
</compile_context>

<pallas_src>
import functools

import jax
import jax.numpy as jnp
from jax.experimental import pallas as pl
from jax.experimental.pallas import tpu as pltpu


def _make_vq_kernel(b_tile, k, c, tile_hw, hw, needs_mask):
    """Build the kernel for one (batch-block, spatial-tile) grid step.

    Block shapes seen by the kernel:
      x_ref   : (b_tile, C, T)      latents, channels in sublanes / spatial in lanes
      e_ref   : (K, D)              codebook
      et_ref  : (D, K)              codebook transpose (precomputed)
      esq_ref : (K, 1)              ||e_k||^2         (precomputed)
      q_ref   : (b_tile, C, T)      quantized latents (input dtype, NCHW-native)
      sse_ref : (b_tile, 1, 1, T)   per-lane partial sums of (q - x)^2
    """

    def kernel(x_ref, e_ref, et_ref, esq_ref, q_ref, sse_ref):
        e = e_ref[...]                     # (K, D) f32
        e_t = et_ref[...]                  # (D, K) f32
        e_sq = esq_ref[...]                # (K, 1) f32

        # Hoisted, batch-row-invariant values (broadcasts are not CSE'd by JAX).
        iota_f = jax.lax.broadcasted_iota(
            jnp.int32, (k, tile_hw), 0).astype(jnp.float32)          # (K, T)
        if needs_mask:
            s = pl.program_id(1)
            lane = jax.lax.broadcasted_iota(jnp.int32, (1, tile_hw), 1)
            valid = ((s * tile_hw + lane) < hw).astype(jnp.float32)  # (1, T)

        # Static, small batch-row loop (b_tile is a compile-time constant).
        for r in range(b_tile):
            x = x_ref[r].astype(jnp.float32)                         # (C, T)

            # Distance up to the argmin-irrelevant ||x_n||^2 term:
            #   score[k, n] = ||e_k||^2 - 2 <e_k, x_n>
            xe = jnp.dot(e, x, preferred_element_type=jnp.float32)   # (K, T)
            score = e_sq - 2.0 * xe                                  # (K, T)

            # First-minimum index per lane (torch.argmin semantics) via
            # min + iota, lowering to plain f32 sublane reductions.
            min_s = jnp.min(score, axis=0, keepdims=True)            # (1, T)
            first_idx = jnp.min(
                jnp.where(score == min_s, iota_f, float(k)),
                axis=0, keepdims=True)                               # (1, T)
            one_hot = (iota_f == first_idx).astype(jnp.float32)      # (K, T)

            # Embedding gather == e^T @ one_hot, directly in (C, T) layout.
            q = jnp.dot(e_t, one_hot,
                        preferred_element_type=jnp.float32)          # (C, T)
            q_ref[r] = q.astype(q_ref.dtype)

            # Lane-dense partial SSE: one sublane reduce, masked only if the
            # last spatial tile is padded.  Cross-lane reduce happens once in
            # the wrapper.
            d = q - x
            row = jnp.sum(d * d, axis=0, keepdims=True)              # (1, T)
            if needs_mask:
                row = row * valid
            sse_ref[r, 0] = row

    return kernel


def _round_up(x, m):
    return ((x + m - 1) // m) * m


def _plan_tiles(B, C, HW, itemsize):
    """Pick (b_tile, tile_hw, num_s) from a per-step HBM-traffic target."""
    # Bytes moved per spatial position per step: x in + q out (+4B f32 sse).
    bytes_per_pos = C * 2 * itemsize + 4
    target_positions = max(512, (1 << 20) // bytes_per_pos)   # ~1 MiB / step
    target_positions = max(128, (target_positions // 128) * 128)
    tile_target = min(target_positions, 32768)                # VMEM sanity cap

    hw_128 = _round_up(HW, 128)
    if hw_128 <= tile_target:
        num_s = 1
        tile_hw = hw_128
    else:
        # Balance tile sizes across num_s steps to minimize padding.
        num_s = pl.cdiv(HW, tile_target)
        tile_hw = _round_up(pl.cdiv(HW, num_s), 128)

    # Batch-blocking: grow the block along batch when one image is small, but
    # keep >= 2 grid steps along the (parallel) batch axis when B >= 2 so both
    # v7x TensorCores get work.
    b_tile = 1
    if num_s == 1:
        max_rows = max(1, tile_target // tile_hw)
        min_batch_steps = 2 if B >= 2 else 1
        for cand in range(min(B, max_rows), 0, -1):
            if B % cand == 0 and B // cand >= min_batch_steps:
                b_tile = cand
                break
    return b_tile, tile_hw, num_s


@functools.partial(jax.jit, static_argnames=("beta",))
def vector_quantizer_forward(latents_nchw, embedding, beta=0.25):
    """Matches VectorQuantizer.forward (forward values only).

    Returns (quantized_latents_nchw, vq_loss).
    """
    B, C, H, W = latents_nchw.shape
    K, D = embedding.shape
    assert C == D, "channel dim must equal embedding_dim"
    HW = H * W
    in_dtype = latents_nchw.dtype
    itemsize = jnp.dtype(in_dtype).itemsize

    b_tile, tile_hw, num_s = _plan_tiles(B, C, HW, itemsize)
    HW_pad = num_s * tile_hw
    needs_mask = HW_pad != HW

    # Free reshape: (B, C, H, W) -> (B, C, H*W).  No transpose, no dtype cast.
    x3 = latents_nchw.reshape(B, C, HW)
    if needs_mask:
        x3 = jnp.pad(x3, ((0, 0), (0, 0), (0, HW_pad - HW)))

    # Codebook invariants hoisted out of the kernel (computed once).
    e_f32 = embedding.astype(jnp.float32)
    e_t = e_f32.T                                          # (D, K)
    e_sq = jnp.sum(e_f32 * e_f32, axis=1, keepdims=True)   # (K, 1)

    # VMEM budget: double-buffered x/q/sse blocks + in-kernel f32 intermediates.
    blk_bytes = b_tile * C * tile_hw * itemsize
    sse_bytes = b_tile * tile_hw * 4
    interm_bytes = (8 * K + 8 * C) * tile_hw * 4
    vmem_est = 2 * (2 * blk_bytes + sse_bytes) + interm_bytes + (64 << 10)
    vmem_limit = int(min(48 << 20, max(32 << 20, 2 * vmem_est)))

    kernel = _make_vq_kernel(b_tile, K, C, tile_hw, HW, needs_mask)

    q3, sse = pl.pallas_call(
        kernel,
        out_shape=(
            jax.ShapeDtypeStruct((B, C, HW_pad), in_dtype),
            jax.ShapeDtypeStruct((B, num_s, 1, tile_hw), jnp.float32),
        ),
        grid_spec=pltpu.PrefetchScalarGridSpec(
            num_scalar_prefetch=0,
            grid=(B // b_tile, num_s),
            in_specs=[
                pl.BlockSpec((b_tile, C, tile_hw), lambda b, s: (b, 0, s)),  # latents
                pl.BlockSpec((K, D), lambda b, s: (0, 0)),                   # codebook
                pl.BlockSpec((D, K), lambda b, s: (0, 0)),                   # codebook^T
                pl.BlockSpec((K, 1), lambda b, s: (0, 0)),                   # ||e||^2
            ],
            out_specs=(
                pl.BlockSpec((b_tile, C, tile_hw), lambda b, s: (b, 0, s)),      # q
                pl.BlockSpec((b_tile, 1, 1, tile_hw), lambda b, s: (b, s, 0, 0)),  # SSE
            ),
        ),
        compiler_params=pltpu.CompilerParams(
            # Per-tile SSE partials (no resident accumulator) => both axes are
            # independent, enabling megacore sharding on v7x.
            dimension_semantics=("parallel", "parallel"),
            vmem_limit_bytes=vmem_limit,
        ),
    )(x3, e_f32, e_t, e_sq)

    mse = jnp.sum(sse) / (B * HW * D)
    # Forward values: commitment_loss == embedding_loss == mse (detach only
    # affects gradients), so vq_loss = beta * mse + mse.
    vq_loss = mse * beta + mse
    # Straight-through estimator: forward value is just the quantized latents.
    # TODO(synk): gradient/detach semantics of the straight-through estimator
    # are autograd-only and not represented in this forward-value kernel.
    quantized = q3[:, :, :HW].reshape(B, C, H, W)   # free reshape back to NCHW
    return quantized, vq_loss


def _reference_forward(latents_nchw, embedding, beta=0.25):
    """Pure-JAX reference mirroring the PyTorch forward, for validation."""
    B, C, H, W = latents_nchw.shape
    K, D = embedding.shape
    x = jnp.transpose(latents_nchw, (0, 2, 3, 1)).reshape(-1, D)
    dist = (
        jnp.sum(x ** 2, axis=1, keepdims=True)
        + jnp.sum(embedding ** 2, axis=1)
        - 2.0 * x @ embedding.T
    )
    inds = jnp.argmin(dist, axis=1)
    q = embedding[inds]
    mse = jnp.mean((q - x) ** 2)
    vq_loss = mse * beta + mse
    q_nchw = jnp.transpose(q.reshape(B, H, W, D), (0, 3, 1, 2))
    return q_nchw, vq_loss


if __name__ == "__main__":
    # Module hyper-params (small, consistent with the forward pass):
    num_embeddings = 8      # K
    embedding_dim = 4       # D (== input channels)
    beta = 0.25

    key = jax.random.PRNGKey(0)
    k_emb, k_lat = jax.random.split(key)

    # nn.Embedding(K, D).weight.data.uniform_(-1/K, 1/K)  (deterministic init)
    embedding = jax.random.uniform(
        k_emb, (num_embeddings, embedding_dim),
        minval=-1.0 / num_embeddings, maxval=1.0 / num_embeddings,
        dtype=jnp.float32,
    )

    # latents: NCHW, batch=2, channels=D=4, spatial=16x16
    latents = jax.random.normal(k_lat, (2, embedding_dim, 16, 16), dtype=jnp.float32)

    quantized, vq_loss = vector_quantizer_forward(latents, embedding, beta=beta)
    quantized = jax.block_until_ready(quantized)
    vq_loss = jax.block_until_ready(vq_loss)

    # validate against pure-JAX reference
    q_ref, loss_ref = _reference_forward(latents, embedding, beta=beta)
    assert quantized.shape == latents.shape
    assert jnp.allclose(quantized, q_ref, atol=1e-5, rtol=1e-5)
    assert jnp.allclose(vq_loss, loss_ref, atol=1e-6, rtol=1e-5)

    print("KERNEL_OK")
</pallas_src>

<mosaic_0001>
module attributes {stable_mosaic.version = 11 : i64} {
  func.func @kernel(%arg0: i32, %arg1: i32, %arg2: memref<1x4x256xf32, #tpu.memory_space<vmem>>, %arg3: memref<8x4xf32, #tpu.memory_space<vmem>>, %arg4: memref<4x8xf32, #tpu.memory_space<vmem>>, %arg5: memref<8x1xf32, #tpu.memory_space<vmem>>, %arg6: memref<1x4x256xf32, #tpu.memory_space<vmem>>, %arg7: memref<1x1x1x256xf32, #tpu.memory_space<vmem>>) attributes {dimension_semantics = [#tpu.dimension_semantics<parallel>, #tpu.dimension_semantics<parallel>], iteration_bounds = array<i64: 2, 1>, scalar_prefetch = 0 : i64, scratch_operands = 0 : i64, tpu.core_type = #tpu.core_type<tc>, window_params = [{transform_indices = @transform_0, window_bounds = array<i64: 1, 4, 256>}, {pipeline_mode = #tpu.pipeline_mode<synchronous>, transform_indices = @transform_1, window_bounds = array<i64: 8, 4>}, {pipeline_mode = #tpu.pipeline_mode<synchronous>, transform_indices = @transform_2, window_bounds = array<i64: 4, 8>}, {pipeline_mode = #tpu.pipeline_mode<synchronous>, transform_indices = @transform_3, window_bounds = array<i64: 8, 1>}, {transform_indices = @transform_4, window_bounds = array<i64: 1, 4, 256>}, {transform_indices = @transform_5, window_bounds = array<i64: 1, 1, 1, 256>}]} {
    %c0 = arith.constant 0 : index
    %c0_0 = arith.constant 0 : index
    %0 = vector.load %arg3[%c0, %c0_0] : memref<8x4xf32, #tpu.memory_space<vmem>>, vector<8x4xf32>
    %c0_1 = arith.constant 0 : index
    %c0_2 = arith.constant 0 : index
    %1 = vector.load %arg4[%c0_1, %c0_2] : memref<4x8xf32, #tpu.memory_space<vmem>>, vector<4x8xf32>
    %c0_3 = arith.constant 0 : index
    %c0_4 = arith.constant 0 : index
    %2 = vector.load %arg5[%c0_3, %c0_4] : memref<8x1xf32, #tpu.memory_space<vmem>>, vector<8x1xf32>
    %3 = tpu.iota {dimensions = array<i32: 0>} : vector<8x256xi32>
    %4 = arith.sitofp %3 : vector<8x256xi32> to vector<8x256xf32>
    %c0_5 = arith.constant 0 : index
    %c0_6 = arith.constant 0 : index
    %c0_7 = arith.constant 0 : index
    %5 = vector.load %arg2[%c0_5, %c0_6, %c0_7] : memref<1x4x256xf32, #tpu.memory_space<vmem>>, vector<1x4x256xf32>
    %6 = vector.shape_cast %5 : vector<1x4x256xf32> to vector<4x256xf32>
    %cst = arith.constant dense<0.000000e+00> : vector<8x256xf32>
    %7 = tpu.matmul %0, %6, %cst {dimension_numbers = #tpu.dot_dimension_numbers<[1], [0], [0], [1], [0, 0, 1, 1], [], []>} : vector<8x4xf32>, vector<4x256xf32>, vector<8x256xf32> -> vector<8x256xf32>
    %cst_8 = arith.constant 2.000000e+00 : f32
    %8 = vector.broadcast %cst_8 : f32 to vector<8x256xf32>
    %9 = arith.mulf %8, %7 : vector<8x256xf32>
    %10 = vector.broadcast %2 : vector<8x1xf32> to vector<8x256xf32>
    %11 = arith.subf %10, %9 : vector<8x256xf32>
    %cst_9 = arith.constant dense<0x7F800000> : vector<256xf32>
    %12 = vector.multi_reduction <minimumf>, %11, %cst_9 [0] : vector<8x256xf32> to vector<256xf32>
    %13 = vector.shape_cast %12 : vector<256xf32> to vector<1x256xf32>
    %14 = vector.broadcast %13 : vector<1x256xf32> to vector<8x256xf32>
    %15 = arith.cmpf oeq, %11, %14 : vector<8x256xf32>
    %cst_10 = arith.constant 8.000000e+00 : f32
    %16 = vector.broadcast %cst_10 : f32 to vector<8x256xf32>
    %17 = arith.select %15, %4, %16 : vector<8x256xi1>, vector<8x256xf32>
    %cst_11 = arith.constant dense<0x7F800000> : vector<256xf32>
    %18 = vector.multi_reduction <minimumf>, %17, %cst_11 [0] : vector<8x256xf32> to vector<256xf32>
    %19 = vector.shape_cast %18 : vector<256xf32> to vector<1x256xf32>
    %20 = vector.broadcast %19 : vector<1x256xf32> to vector<8x256xf32>
    %21 = arith.cmpf oeq, %4, %20 : vector<8x256xf32>
    %22 = arith.extui %21 : vector<8x256xi1> to vector<8x256xi32>
    %23 = arith.sitofp %22 : vector<8x256xi32> to vector<8x256xf32>
    %cst_12 = arith.constant dense<0.000000e+00> : vector<4x256xf32>
    %24 = tpu.matmul %1, %23, %cst_12 {dimension_numbers = #tpu.dot_dimension_numbers<[1], [0], [0], [1], [0, 0, 1, 1], [], []>} : vector<4x8xf32>, vector<8x256xf32>, vector<4x256xf32> -> vector<4x256xf32>
    %c0_13 = arith.constant 0 : index
    %c0_14 = arith.constant 0 : index
    %c0_15 = arith.constant 0 : index
    %25 = vector.load %arg6[%c0_13, %c0_14, %c0_15] : memref<1x4x256xf32, #tpu.memory_space<vmem>>, vector<1x4x256xf32>
    %26 = vector.shape_cast %25 : vector<1x4x256xf32> to vector<4x256xf32>
    %27 = vector.shape_cast %24 : vector<4x256xf32> to vector<1x4x256xf32>
    tpu.vector_store %arg6[%c0_13, %c0_14, %c0_15], %27 {strides = array<i32>} : memref<1x4x256xf32, #tpu.memory_space<vmem>>, vector<1x4x256xf32>,
    %28 = arith.subf %24, %6 : vector<4x256xf32>
    %29 = arith.mulf %28, %28 : vector<4x256xf32>
    %cst_16 = arith.constant dense<0.000000e+00> : vector<256xf32>
    %30 = vector.multi_reduction <add>, %29, %cst_16 [0] : vector<4x256xf32> to vector<256xf32>
    %31 = vector.shape_cast %30 : vector<256xf32> to vector<1x256xf32>
    %c0_17 = arith.constant 0 : index
    %c0_18 = arith.constant 0 : index
    %c0_19 = arith.constant 0 : index
    %c0_20 = arith.constant 0 : index
    %32 = vector.load %arg7[%c0_17, %c0_18, %c0_19, %c0_20] : memref<1x1x1x256xf32, #tpu.memory_space<vmem>>, vector<1x1x1x256xf32>
    %33 = vector.shape_cast %32 : vector<1x1x1x256xf32> to vector<1x256xf32>
    %34 = vector.shape_cast %31 : vector<1x256xf32> to vector<1x1x1x256xf32>
    tpu.vector_store %arg7[%c0_17, %c0_18, %c0_19, %c0_20], %34 {strides = array<i32>} : memref<1x1x1x256xf32, #tpu.memory_space<vmem>>, vector<1x1x1x256xf32>,
    return
  }
  func.func @transform_0(%arg0: i32, %arg1: i32) -> (i32, i32, i32) {
    %c0_i32 = arith.constant 0 : i32
    %c0_i32_0 = arith.constant 0 : i32
    return %arg0, %c0_i32, %arg1 : i32, i32, i32
  }
  func.func @transform_1(%arg0: i32, %arg1: i32) -> (i32, i32) {
    %c0_i32 = arith.constant 0 : i32
    %c0_i32_0 = arith.constant 0 : i32
    %c0_i32_1 = arith.constant 0 : i32
    return %c0_i32, %c0_i32_0 : i32, i32
  }
  func.func @transform_2(%arg0: i32, %arg1: i32) -> (i32, i32) {
    %c0_i32 = arith.constant 0 : i32
    %c0_i32_0 = arith.constant 0 : i32
    %c0_i32_1 = arith.constant 0 : i32
    return %c0_i32, %c0_i32_0 : i32, i32
  }
  func.func @transform_3(%arg0: i32, %arg1: i32) -> (i32, i32) {
    %c0_i32 = arith.constant 0 : i32
    %c0_i32_0 = arith.constant 0 : i32
    %c0_i32_1 = arith.constant 0 : i32
    return %c0_i32, %c0_i32_0 : i32, i32
  }
  func.func @transform_4(%arg0: i32, %arg1: i32) -> (i32, i32, i32) {
    %c0_i32 = arith.constant 0 : i32
    %c0_i32_0 = arith.constant 0 : i32
    return %arg0, %c0_i32, %arg1 : i32, i32, i32
  }
  func.func @transform_5(%arg0: i32, %arg1: i32) -> (i32, i32, i32, i32) {
    %c0_i32 = arith.constant 0 : i32
    %c0_i32_0 = arith.constant 0 : i32
    %c0_i32_1 = arith.constant 0 : i32
    return %arg0, %arg1, %c0_i32, %c0_i32_0 : i32, i32, i32, i32
  }
}

</mosaic_0001>

<bundles_post_ra>
// kernel: vector_quantizer_forward.1
= control target key start
LH: loop header
LB: loop body
LE: loop exit
PB: predicated region body
PF: predicated region fallthrough
CT: control target
= control target key end

     0   :  { %s783_s18 = smov 0   ;;  %s785_s19 = smov 0   ;;  %s842_s0 = inlined_call_operand.vmem [shape: f32[2,4,256], index: 0, kind: input, shape index: {}]   ;;  %s843_s1 = inlined_call_operand.vmem [shape: f32[8,4], index: 1, kind: input, shape index: {}]   ;;  %s844_s2 = inlined_call_operand.vmem [shape: f32[4,8], index: 2, kind: input, shape index: {}]   ;;  %s845_s3 = inlined_call_operand.vmem [shape: f32[8,1], index: 3, kind: input, shape index: {}]   ;;  %s846_s4 = inlined_call_operand.vmem [shape: f32[2,4,256], index: 4, kind: output, shape index: {0}]   ;;  %s847_s5 = inlined_call_operand.vmem [shape: f32[2,1,1,256], index: 5, kind: output, shape index: {1}]  }
   0x1   :  { %s787_s20 = smov 0  }
   0x2 LB: > { %s28_s21 = sadd.s32 1, %s743_s19  ;;  %p677_p0 = scmp.ge.s32.totalorder %s747_s20, 1  ;;  %s747_s20 = sphi %s787_s20, %s16_s20   ;;  %s743_s19 = sphi %s785_s19, %s849_s19   ;;  %s739_s18 = sphi %s783_s18, %s848_s18  }
   0x3   : > { %p30_p1 = scmp.ge.s32.totalorder %s28_s21, 2  ;;  %p213_p2 = scmp.lt.s32.totalorder %s747_s20, 3 }
   0x5   : > { %s851_s21 = smov (%p30_p1, %s28_s21), 0  ;;  %p214_p3 = pnand %p677_p0, %p213_p2 }
   0x6   : > { %p258_p4 = scmp.lt.s32.totalorder (!%p214_p3), %s739_s18, 1  ;;  %v749_v0 = vmov (!%p214_p3), 0.0   ;;  %v750_v1 = vmov (!%p214_p3), 0   ;;  %v287_v2 = vld [vmem:[%s845_s3] sm:$0xff] (!%p214_p3)  ;;  %vm298_vm0 = vcmask (!%p214_p3), 1043456   ;;  %vm294_vm1 = vcmask (!%p214_p3), 31744  }
   0x7   : > { %217 = sbr.rel (%p214_p3) target bundleno = 505 (0x1f9), region = 36  ;;  %367 = vmatprep.mubr.f32.mxu0 (!%p214_p3), %v749_v0  ;;  %723 = vset.pattern.permute.xlu0 (!%p214_p3), %v750_v1  ;;  %v285_v5 = vld [vmem:[%s843_s1] sm:$0xff] (!%p214_p3)  ;;  %v288_v14 = vlaneseq (!%p214_p3)  ;;  %vm417_vm5 = vcmask (!%p214_p3), 64512   ;;  %v751_v43 = vmov (!%p214_p3), 1.0   ;;  %v752_v57 = vmov (!%p214_p3), 1966171168  }
   0x8   : > { %378 = vperm.xlu0 (!%p214_p3), %723, %v287_v2   ;;  %485 = vmatprep.mubr.f32.mxu1 (!%p214_p3), %v749_v0  ;;  %v286_v42 = vld [vmem:[%s844_s2] sm:$0xf] (!%p214_p3)  ;;  %v520_v58 = vunpack.c.l.s4 (!%p214_p3), %v752_v57 }
   0x9   : > { %v289_v19 = vshrl.u32 (!%p214_p3), %v288_v14, 7  ;;  %vm536_vm7 = vcmp.lt.s32.totalorder (!%p214_p3), %v288_v14, 256 }
   0xa   : > { %v521_v63 = vunpack.c.0.s8 (!%p214_p3), %v520_v58 }
   0xb   : > { %v290_v24 = vcvt.s32.f32 (!%p214_p3), %v289_v19 }
   0xe   : > { %s853_s18 = smov (!%p258_p4, %s739_s18), 1 }
   0xf   : > { %s693_s24 = sshll.u32 %s853_s18, 3  ;;  %s682_s10 = sshll.u32 %s853_s18, 1 }
  0x10   : > { %s265_s27 = scalar_lea.vmem %s842_s0, %s693_s24  ;;  %s275_s9 = scalar_lea.vmem %s846_s4, %s693_s24 }
  0x11   : > { %v291_v3 = vld [vmem:[%s265_s27] sm:$0xff]  ;;  %s284_s13 = scalar_lea.vmem %s847_s5, %s682_s10 }
  0x12   : > { %v293_v4 = vcombine.high %v291_v3, %v291_v3 }
  0x14   : > { %683 = vmatprep.subr.msk.mxu0 %vm298_vm0, %v293_v4 }
  0x15   : > { %684 = vmatpush1.msk.msra.mxu0 %vm298_vm0, %v291_v3 }
  0x16   : > { %685 = vmatmul.mubr.msk.f32.vlgmr.msra.gmra.mrb[0].mxu0 %vm294_vm1, %v285_v5 }
  0x87   : > { %v379_v7 = vpop.permute.xlu0 %378 }
  0xe9   : > { %v369_v6 = vpop.f32.mrb[0].mxu0 }
  0xea   : > { %v374_v8 = vmul.f32 2.0, %v369_v6  ;;  %v371_v9 = vpop.f32.mrb[1].mxu0 }
  0xeb   : > { %v375_v10 = vmul.f32 2.0, %v371_v9 }
  0xec   : > { %v381_v11 = vsub.f32 %v379_v7, %v374_v8 }
  0xed   : > { %v382_v12 = vsub.f32 %v379_v7, %v375_v10 }
  0xee   : > { %v383_v13 = vrot.slane %v381_v11, 4 }
  0xef   : > { %v389_v15 = vrot.slane %v382_v12, 4 }
  0xf0   : > { %v384_v16 = vmin.f32 %v381_v11, %v383_v13 }
  0xf1   : > { %v390_v17 = vmin.f32 %v382_v12, %v389_v15 }
  0xf2   : > { %v385_v18 = vrot.slane %v384_v16, 2 }
  0xf3   : > { %v391_v20 = vrot.slane %v390_v17, 2 }
  0xf4   : > { %v386_v21 = vmin.f32 %v384_v16, %v385_v18 }
  0xf5   : > { %v392_v22 = vmin.f32 %v390_v17, %v391_v20 }
  0xf6   : > { %v387_v23 = vrot.slane %v386_v21, 1 }
  0xf7   : > { %v393_v25 = vrot.slane %v392_v22, 1 }
  0xf8   : > { %v388_v26 = vmin.f32 %v386_v21, %v387_v23 }
  0xf9   : > { %v394_v27 = vmin.f32 %v392_v22, %v393_v25 }
  0xfa   : > { %vm395_vm2 = vcmp.eq.f32.partialorder %v381_v11, %v388_v26 }
  0xfb   : > { %vm396_vm3 = vcmp.eq.f32.partialorder %v382_v12, %v394_v27  ;;  %v397_v28 = vsel %vm395_vm2, %v290_v24, 8.0 }
  0xfc   : > { %v398_v29 = vsel %vm396_vm3, %v290_v24, 8.0  ;;  %v399_v30 = vrot.slane %v397_v28, 4 }
  0xfd   : > { %v405_v31 = vrot.slane %v398_v29, 4 }
  0xfe   : > { %v400_v32 = vmin.f32 %v397_v28, %v399_v30 }
  0xff   : > { %v406_v33 = vmin.f32 %v398_v29, %v405_v31 }
 0x100   : > { %v401_v34 = vrot.slane %v400_v32, 2 }
 0x101   : > { %v407_v35 = vrot.slane %v406_v33, 2 }
 0x102   : > { %v402_v36 = vmin.f32 %v400_v32, %v401_v34 }
 0x103   : > { %v408_v37 = vmin.f32 %v406_v33, %v407_v35 }
 0x104   : > { %v403_v38 = vrot.slane %v402_v36, 1 }
 0x105   : > { %v409_v39 = vrot.slane %v408_v37, 1 }
 0x106   : > { %v404_v40 = vmin.f32 %v402_v36, %v403_v38 }
 0x107   : > { %v410_v41 = vmin.f32 %v408_v37, %v409_v39 }
 0x108   : > { %vm411_vm6 = vcmp.eq.f32.partialorder %v290_v24, %v404_v40 }
 0x109   : > { %vm412_vm4 = vcmp.eq.f32.partialorder %v290_v24, %v410_v41 }
 0x10a   : > { %688 = vmatprep.subr.msk.mxu1 %vm412_vm4, %v751_v43 }
 0x10b   : > { %689 = vmatpush1.msk.msra.mxu1 %vm411_vm6, %v751_v43 }
 0x10c   : > { %690 = vmatmul.mubr.msk.f32.vlgmr.msra.gmra.mrb[0].mxu1 %vm417_vm5, %v286_v42 }
 0x1df   : > { %v487_v44 = vpop.f32.mrb[0].mxu1 }
 0x1e0   : > { %v498_v45 = vsub.f32 %v487_v44, %v291_v3  ;;  %v489_v46 = vpop.f32.mrb[1].mxu1 }
 0x1e1   : > { %v494_v47 = vcombine.low %v487_v44, %v489_v46  ;;  %v499_v48 = vsub.f32 %v489_v46, %v293_v4  ;;  %v524_v4 = vsub.s32 %v521_v63, %v289_v19 }
 0x1e2   : > { %v500_v49 = vmul.f32 %v498_v45, %v498_v45 }
 0x1e3   : > { %496 = vst [vmem:[%s275_s9] sm:$0xff] %v494_v47  ;;  %v501_v50 = vmul.f32 %v499_v48, %v499_v48 }
 0x1e4   : > { %v502_v51 = vsel %vm298_vm0, %v500_v49, 0.0 }
 0x1e5   : > { %v503_v52 = vrot.slane %v502_v51, 4  ;;  %v509_v53 = vsel %vm298_vm0, %v501_v50, 0.0 }
 0x1e6   : > { %v510_v54 = vrot.slane %v509_v53, 4 }
 0x1e7   : > { %v504_v55 = vadd.f32 %v503_v52, %v502_v51 }
 0x1e8   : > { %v511_v56 = vadd.f32 %v510_v54, %v509_v53 }
 0x1e9   : > { %v505_v59 = vrot.slane %v504_v55, 2 }
 0x1ea   : > { %v512_v60 = vrot.slane %v511_v56, 2 }
 0x1eb   : > { %v506_v61 = vadd.f32 %v505_v59, %v504_v55 }
 0x1ec   : > { %v513_v62 = vadd.f32 %v512_v60, %v511_v56 }
 0x1ed   : > { %v507_v0 = vrot.slane %v506_v61, 1 }
 0x1ee   : > { %v514_v1 = vrot.slane %v513_v62, 1 }
 0x1ef   : > { %v508_v2 = vadd.f32 %v507_v0, %v506_v61 }
 0x1f0   : > { %v515_v3 = vadd.f32 %v514_v1, %v513_v62 }
 0x1f2   : > { %v518_v5 = vcombine.low %v508_v2, %v515_v3 }
 0x1f4   : > { %v525_v6 = vrot.slane %v518_v5, %v524_v4 }
 0x1f6   : > { %v532_v7 = vrot.slane %v525_v6, %v524_v4 }
 0x1f8   : > { %538 = vst.msk [vmem:[%s284_s13] sm:$0x3] %vm536_vm7, %v532_v7 }
 0x1f9 PF: > { %s16_s20 = sadd.s32 1, %s747_s20   ;;  %s848_s18 = smov %s743_s19 }
 0x1fa   : > { %p13_p5 = scmp.ge.s32.totalorder %s16_s20, 4   ;;  %s849_s19 = smov %s851_s21 }
 0x1fc   :  { %15 = sbr.rel (!%p13_p5) target bundleno = 2 (0x2), region = 78 }

</bundles_post_ra>
